<compile_context>
chip_gen: v6e
topology: v6e:2x2x1
jax: 0.10.0
libtpu: 0.0.40
codegen_flags: <defaults>
</compile_context>

<pallas_src>
import functools

import jax
import jax.numpy as jnp
from jax.experimental import pallas as pl
from jax.experimental.pallas import tpu as pltpu

_LANES = 128
_ROW_CHUNK = 256   # sublane chunk for the (rows, 128) layout (mult. of 8/16/32)
_COL_CHUNK = 512   # lane chunk for the flat (B, hw) layout (multiple of 128)


def _vmem_capacity_bytes():
    try:
        return int(pltpu.get_tpu_info().vmem_capacity_bytes)
    except Exception:
        return 64 * 1024 * 1024  # conservative (v7x per-TensorCore VMEM)


def _ncc_sums_kernel(t_ref, p_ref, si_ref, sj_ref, sii_ref, sjj_ref, sij_ref,
                     *, n_split, block_extent, chunk, n_chunks, valid_extent,
                     mask_tail, three_d):
    """Grid = (split, batch_blocks, reduction_steps); reduction innermost.

    Outputs are the accumulators (revisited across the reduction axis)."""
    s = pl.program_id(0)
    k = pl.program_id(2)

    @pl.when(k == 0)
    def _init():
        for r in (si_ref, sj_ref, sii_ref, sjj_ref, sij_ref):
            r[...] = jnp.zeros_like(r)

    # Global block index / element offset along the reduction axis (rows or
    # columns), accounting for the interleaved core split.
    kb = k * n_split + s
    base = kb * block_extent

    def accumulate(off):
        # Stream native dtype from HBM; cast to f32 only in-register, per chunk,
        # so elementwise-product temporaries never exceed a chunk.
        if three_d:
            I = t_ref[:, pl.ds(off, chunk), :].astype(jnp.float32)  # y_true
            J = p_ref[:, pl.ds(off, chunk), :].astype(jnp.float32)  # y_pred
        else:
            I = t_ref[:, pl.ds(off, chunk)].astype(jnp.float32)
            J = p_ref[:, pl.ds(off, chunk)].astype(jnp.float32)
        if mask_tail:
            # Ragged tail: the last (partial) block's DMA is clamped by Pallas;
            # zero out the stale region so it does not perturb any sum.
            shape = (1, chunk, 1) if three_d else (1, chunk)
            idx = base + off + jax.lax.broadcasted_iota(jnp.int32, shape, 1)
            valid = idx < valid_extent
            I = jnp.where(valid, I, 0.0)
            J = jnp.where(valid, J, 0.0)
        if three_d:
            # Sublane-dense chunk: reduce the row axis, keep 128 lanes.
            si_ref[...] += jnp.sum(I, axis=1)
            sj_ref[...] += jnp.sum(J, axis=1)
            sii_ref[...] += jnp.sum(I * I, axis=1)
            sjj_ref[...] += jnp.sum(J * J, axis=1)
            sij_ref[...] += jnp.sum(I * J, axis=1)
        else:
            # Lane-dense chunk: accumulate full-width; lanes folded in JAX.
            si_ref[...] += I
            sj_ref[...] += J
            sii_ref[...] += I * I
            sjj_ref[...] += J * J
            sij_ref[...] += I * J

    if n_chunks == 1:
        accumulate(0)
    else:
        def body(c, carry):
            accumulate(pl.multiple_of(c * chunk, chunk))
            return carry
        jax.lax.fori_loop(0, n_chunks, body, 0, unroll=n_chunks <= 8)


def ncc(y_pred, y_true, *, eps=1e-5, vmem_block_bytes=None):
    """Pallas equivalent of NCC().forward(y_pred, y_true). Returns shape (B,)."""
    assert y_pred.shape == y_true.shape, "y_pred / y_true shape mismatch"
    assert y_true.ndim >= 3, "expected (B, C, *spatial)"
    B, C = int(y_true.shape[0]), int(y_true.shape[1])
    assert C == 1, "PyTorch NCC uses a [1,1,*win] conv filter => C must be 1"
    hw = 1
    for d in y_true.shape[2:]:
        hw *= int(d)
    win = float(hw)
    out_dtype = jnp.result_type(y_pred.dtype, y_true.dtype)

    # Ii = y_true, Ji = y_pred (matches `self._ncc(y_true, y_pred)`); free view.
    t = y_true.reshape(B, hw)
    p = y_pred.reshape(B, hw)
    itemsize = max(jnp.dtype(t.dtype).itemsize, jnp.dtype(p.dtype).itemsize)

    # ---- VMEM budget (generation aware: 64 MiB/TC on v7x, 128 MiB on v5e/v6e).
    cap = _vmem_capacity_bytes()
    if vmem_block_bytes is None:
        vmem_block_bytes = max(1 << 20, min(8 << 20, cap // 16))
    vmem_limit = int(min(cap // 2,
                         max(16 << 20, 8 * vmem_block_bytes + (8 << 20))))

    # ---- batch blocking: tb = min(B, 8); a partial last batch block is fine
    # (per-image stats never mix across the batch axis; OOB rows are discarded).
    tb = B if B <= 8 else 8
    n_b = pl.cdiv(B, tb)

    # ---- reduction-axis layout & tiling (no wrapper-side padding of the data).
    if hw % _LANES == 0:
        # Sublane-dense view: each image is (rows, 128); the reshape is free.
        rows = hw // _LANES
        xs = (t.reshape(B, rows, _LANES), p.reshape(B, rows, _LANES))
        three_d = True
        chunk = _ROW_CHUNK
        budget = max(8, vmem_block_bytes // (tb * _LANES * itemsize))
        if rows <= chunk:
            tile, chunk, n_k, mask_tail = rows, rows, 1, False
        else:
            tile = min((max(budget, chunk) // chunk) * chunk,
                       (rows // chunk) * chunk)
            n_k = pl.cdiv(rows, tile)
            mask_tail = (rows % tile) != 0
        valid_extent = rows
        acc_w = _LANES
        in_block = (tb, tile, _LANES)
    else:
        # Ragged hw: keep the flat (B, hw) layout and mask the tail in-kernel
        # instead of materializing a padded copy in HBM (saves ~2x HBM traffic).
        xs = (t, p)
        three_d = False
        chunk = _COL_CHUNK
        budget = max(_LANES, vmem_block_bytes // (tb * itemsize))
        if hw <= chunk:
            tile, chunk, n_k, mask_tail = hw, hw, 1, False
        else:
            tile = min((max(budget, chunk) // chunk) * chunk,
                       (hw // chunk) * chunk)
            n_k = pl.cdiv(hw, tile)
            mask_tail = (hw % tile) != 0
        valid_extent = hw
        acc_w = chunk
        in_block = (tb, tile)

    n_chunks = tile // chunk

    # ---- optional core split of the reduction axis (2x on v7x for small B;
    # runs serially at negligible cost on single-TensorCore chips).
    n_split = 2 if (n_b == 1 and n_k >= 4 and n_k % 2 == 0) else 1
    k_steps = n_k // n_split

    if three_d:
        in_map = lambda s, b, k: (b, k * n_split + s, 0)
    else:
        in_map = lambda s, b, k: (b, k * n_split + s)
    out_map = lambda s, b, k: (s, b, 0)

    kernel = functools.partial(
        _ncc_sums_kernel, n_split=n_split, block_extent=tile, chunk=chunk,
        n_chunks=n_chunks, valid_extent=valid_extent, mask_tail=mask_tail,
        three_d=three_d)

    out_sds = jax.ShapeDtypeStruct((n_split, B, acc_w), jnp.float32)
    sums = pl.pallas_call(
        kernel,
        out_shape=[out_sds] * 5,
        grid_spec=pltpu.PrefetchScalarGridSpec(
            num_scalar_prefetch=0,
            grid=(n_split, n_b, k_steps),
            in_specs=[pl.BlockSpec(in_block, in_map),
                      pl.BlockSpec(in_block, in_map)],
            out_specs=[pl.BlockSpec((None, tb, acc_w), out_map)] * 5,
        ),
        compiler_params=pltpu.CompilerParams(
            dimension_semantics=("parallel", "parallel", "arbitrary"),
            vmem_limit_bytes=vmem_limit,
        ),
    )(*xs)

    # ---- tiny O(B) finalize in plain JAX (same math as the PyTorch module).
    I_sum, J_sum, I2_sum, J2_sum, IJ_sum = [x.sum(axis=(0, 2)) for x in sums]
    u_I = I_sum / win
    u_J = J_sum / win
    cross = IJ_sum - u_J * I_sum - u_I * J_sum + u_I * u_J * win
    # f32 cancellation can push the variance slightly negative; clamp it.
    I_var = jnp.maximum(I2_sum - 2.0 * u_I * I_sum + u_I * u_I * win, 0.0)
    J_var = jnp.maximum(J2_sum - 2.0 * u_J * J_sum + u_J * u_J * win, 0.0)
    cc = cross / (jnp.sqrt(I_var) * jnp.sqrt(J_var) + eps)
    return cc.astype(out_dtype)


def _ncc_reference(y_pred, y_true, eps=1e-5):
    """Plain-JAX reference mirroring the PyTorch math exactly."""
    B = y_true.shape[0]
    n = 1
    for d in y_true.shape[2:]:
        n *= int(d)
    n = float(n)
    I = y_true.reshape(B, -1).astype(jnp.float32)
    J = y_pred.reshape(B, -1).astype(jnp.float32)
    I_sum = I.sum(-1)
    J_sum = J.sum(-1)
    I2_sum = (I * I).sum(-1)
    J2_sum = (J * J).sum(-1)
    IJ_sum = (I * J).sum(-1)
    u_I = I_sum / n
    u_J = J_sum / n
    cross = IJ_sum - u_J * I_sum - u_I * J_sum + u_I * u_J * n
    I_var = I2_sum - 2 * u_I * I_sum + u_I * u_I * n
    J_var = J2_sum - 2 * u_J * J_sum + u_J * u_J * n
    return cross / (jnp.sqrt(I_var) * jnp.sqrt(J_var) + eps)


if __name__ == "__main__":
    key = jax.random.PRNGKey(0)
    ks = jax.random.split(key, 8)

    # 1) Small aligned case (hw % 128 == 0): single-block sublane-dense path.
    yt = jax.random.normal(ks[0], (2, 1, 16, 16), dtype=jnp.float32)
    yp = jax.random.normal(ks[1], (2, 1, 16, 16), dtype=jnp.float32)
    out = jax.block_until_ready(ncc(yp, yt))
    ref = _ncc_reference(yp, yt)
    assert out.shape == (2,)
    assert jnp.allclose(out, ref, atol=1e-4, rtol=1e-4), (out, ref)

    # 2) Ragged hw (40*40 % 128 != 0): flat masked path, multi-step reduction
    #    forced via a tiny per-block VMEM budget (no wrapper-side padding).
    yt = jax.random.normal(ks[2], (2, 1, 40, 40), dtype=jnp.float32)
    yp = jax.random.normal(ks[3], (2, 1, 40, 40), dtype=jnp.float32)
    out = jax.block_until_ready(ncc(yp, yt, vmem_block_bytes=8 * 1024))
    ref = _ncc_reference(yp, yt)
    assert jnp.allclose(out, ref, atol=1e-4, rtol=1e-4), (out, ref)

    # 3) Aligned, multi-step reduction with a partial last row-block and the
    #    size-2 reduction core-split path (B = 1).
    yt = jax.random.normal(ks[4], (1, 1, 320, 320), dtype=jnp.float32)
    yp = jax.random.normal(ks[5], (1, 1, 320, 320), dtype=jnp.float32)
    out = jax.block_until_ready(ncc(yp, yt, vmem_block_bytes=128 * 1024))
    ref = _ncc_reference(yp, yt)
    assert jnp.allclose(out, ref, atol=1e-4, rtol=1e-4), (out, ref)

    # 4) bf16 inputs, batch > 8 (partial last batch block), default budget.
    yt = jax.random.normal(ks[6], (10, 1, 48, 48), dtype=jnp.bfloat16)
    yp = jax.random.normal(ks[7], (10, 1, 48, 48), dtype=jnp.bfloat16)
    out = jax.block_until_ready(ncc(yp, yt))
    ref = _ncc_reference(yp, yt)
    assert out.shape == (10,)
    assert jnp.allclose(out.astype(jnp.float32), ref, atol=2e-3, rtol=2e-3), (out, ref)

    print("KERNEL_OK")
</pallas_src>

<mosaic_0001>
module attributes {stable_mosaic.version = 11 : i64} {
  func.func @_ncc_sums_kernel(%arg0: i32, %arg1: i32, %arg2: i32, %arg3: memref<2x2x128xf32, #tpu.memory_space<vmem>>, %arg4: memref<2x2x128xf32, #tpu.memory_space<vmem>>, %arg5: memref<1x2x128xf32, #tpu.memory_space<vmem>>, %arg6: memref<1x2x128xf32, #tpu.memory_space<vmem>>, %arg7: memref<1x2x128xf32, #tpu.memory_space<vmem>>, %arg8: memref<1x2x128xf32, #tpu.memory_space<vmem>>, %arg9: memref<1x2x128xf32, #tpu.memory_space<vmem>>) attributes {dimension_semantics = [#tpu.dimension_semantics<parallel>, #tpu.dimension_semantics<parallel>, #tpu.dimension_semantics<arbitrary>], iteration_bounds = array<i64: 1, 1, 1>, scalar_prefetch = 0 : i64, scratch_operands = 0 : i64, tpu.core_type = #tpu.core_type<tc>, window_params = [{transform_indices = @transform_0, window_bounds = array<i64: 2, 2, 128>}, {transform_indices = @transform_1, window_bounds = array<i64: 2, 2, 128>}, {transform_indices = @transform_2, window_bounds = array<i64: 1, 2, 128>}, {transform_indices = @transform_3, window_bounds = array<i64: 1, 2, 128>}, {transform_indices = @transform_4, window_bounds = array<i64: 1, 2, 128>}, {transform_indices = @transform_5, window_bounds = array<i64: 1, 2, 128>}, {transform_indices = @transform_6, window_bounds = array<i64: 1, 2, 128>}]} {
    %c0_i32 = arith.constant 0 : i32
    %0 = arith.cmpi eq, %arg2, %c0_i32 : i32
    %1 = arith.extui %0 : i1 to i32
    %c0_i32_0 = arith.constant 0 : i32
    %2 = arith.cmpi ne, %1, %c0_i32_0 : i32
    scf.if %2 {
      %cst_40 = arith.constant 0.000000e+00 : f32
      %43 = vector.broadcast %cst_40 : f32 to vector<2x128xf32>
      %c0_41 = arith.constant 0 : index
      %c0_42 = arith.constant 0 : index
      %c0_43 = arith.constant 0 : index
      %44 = vector.load %arg5[%c0_41, %c0_42, %c0_43] : memref<1x2x128xf32, #tpu.memory_space<vmem>>, vector<1x2x128xf32>
      %45 = vector.shape_cast %44 : vector<1x2x128xf32> to vector<2x128xf32>
      %46 = vector.shape_cast %43 : vector<2x128xf32> to vector<1x2x128xf32>
      tpu.vector_store %arg5[%c0_41, %c0_42, %c0_43], %46 {strides = array<i32>} : memref<1x2x128xf32, #tpu.memory_space<vmem>>, vector<1x2x128xf32>,
      %cst_44 = arith.constant 0.000000e+00 : f32
      %47 = vector.broadcast %cst_44 : f32 to vector<2x128xf32>
      %c0_45 = arith.constant 0 : index
      %c0_46 = arith.constant 0 : index
      %c0_47 = arith.constant 0 : index
      %48 = vector.load %arg6[%c0_45, %c0_46, %c0_47] : memref<1x2x128xf32, #tpu.memory_space<vmem>>, vector<1x2x128xf32>
      %49 = vector.shape_cast %48 : vector<1x2x128xf32> to vector<2x128xf32>
      %50 = vector.shape_cast %47 : vector<2x128xf32> to vector<1x2x128xf32>
      tpu.vector_store %arg6[%c0_45, %c0_46, %c0_47], %50 {strides = array<i32>} : memref<1x2x128xf32, #tpu.memory_space<vmem>>, vector<1x2x128xf32>,
      %cst_48 = arith.constant 0.000000e+00 : f32
      %51 = vector.broadcast %cst_48 : f32 to vector<2x128xf32>
      %c0_49 = arith.constant 0 : index
      %c0_50 = arith.constant 0 : index
      %c0_51 = arith.constant 0 : index
      %52 = vector.load %arg7[%c0_49, %c0_50, %c0_51] : memref<1x2x128xf32, #tpu.memory_space<vmem>>, vector<1x2x128xf32>
      %53 = vector.shape_cast %52 : vector<1x2x128xf32> to vector<2x128xf32>
      %54 = vector.shape_cast %51 : vector<2x128xf32> to vector<1x2x128xf32>
      tpu.vector_store %arg7[%c0_49, %c0_50, %c0_51], %54 {strides = array<i32>} : memref<1x2x128xf32, #tpu.memory_space<vmem>>, vector<1x2x128xf32>,
      %cst_52 = arith.constant 0.000000e+00 : f32
      %55 = vector.broadcast %cst_52 : f32 to vector<2x128xf32>
      %c0_53 = arith.constant 0 : index
      %c0_54 = arith.constant 0 : index
      %c0_55 = arith.constant 0 : index
      %56 = vector.load %arg8[%c0_53, %c0_54, %c0_55] : memref<1x2x128xf32, #tpu.memory_space<vmem>>, vector<1x2x128xf32>
      %57 = vector.shape_cast %56 : vector<1x2x128xf32> to vector<2x128xf32>
      %58 = vector.shape_cast %55 : vector<2x128xf32> to vector<1x2x128xf32>
      tpu.vector_store %arg8[%c0_53, %c0_54, %c0_55], %58 {strides = array<i32>} : memref<1x2x128xf32, #tpu.memory_space<vmem>>, vector<1x2x128xf32>,
      %cst_56 = arith.constant 0.000000e+00 : f32
      %59 = vector.broadcast %cst_56 : f32 to vector<2x128xf32>
      %c0_57 = arith.constant 0 : index
      %c0_58 = arith.constant 0 : index
      %c0_59 = arith.constant 0 : index
      %60 = vector.load %arg9[%c0_57, %c0_58, %c0_59] : memref<1x2x128xf32, #tpu.memory_space<vmem>>, vector<1x2x128xf32>
      %61 = vector.shape_cast %60 : vector<1x2x128xf32> to vector<2x128xf32>
      %62 = vector.shape_cast %59 : vector<2x128xf32> to vector<1x2x128xf32>
      tpu.vector_store %arg9[%c0_57, %c0_58, %c0_59], %62 {strides = array<i32>} : memref<1x2x128xf32, #tpu.memory_space<vmem>>, vector<1x2x128xf32>,
    } else {
    }
    %c0 = arith.constant 0 : index
    %c0_1 = arith.constant 0 : index
    %c0_2 = arith.constant 0 : index
    %3 = vector.load %arg3[%c0, %c0_1, %c0_2] : memref<2x2x128xf32, #tpu.memory_space<vmem>>, vector<2x2x128xf32>
    %c0_3 = arith.constant 0 : index
    %c0_4 = arith.constant 0 : index
    %c0_5 = arith.constant 0 : index
    %4 = vector.load %arg4[%c0_3, %c0_4, %c0_5] : memref<2x2x128xf32, #tpu.memory_space<vmem>>, vector<2x2x128xf32>
    %c0_6 = arith.constant 0 : index
    %c0_7 = arith.constant 0 : index
    %c0_8 = arith.constant 0 : index
    %5 = vector.load %arg5[%c0_6, %c0_7, %c0_8] : memref<1x2x128xf32, #tpu.memory_space<vmem>>, vector<1x2x128xf32>
    %6 = vector.shape_cast %5 : vector<1x2x128xf32> to vector<2x128xf32>
    %cst = arith.constant dense<0.000000e+00> : vector<2x128xf32>
    %7 = vector.multi_reduction <add>, %3, %cst [1] : vector<2x2x128xf32> to vector<2x128xf32>
    %8 = arith.addf %6, %7 : vector<2x128xf32>
    %c0_9 = arith.constant 0 : index
    %c0_10 = arith.constant 0 : index
    %c0_11 = arith.constant 0 : index
    %9 = vector.load %arg5[%c0_9, %c0_10, %c0_11] : memref<1x2x128xf32, #tpu.memory_space<vmem>>, vector<1x2x128xf32>
    %10 = vector.shape_cast %9 : vector<1x2x128xf32> to vector<2x128xf32>
    %11 = vector.shape_cast %8 : vector<2x128xf32> to vector<1x2x128xf32>
    tpu.vector_store %arg5[%c0_9, %c0_10, %c0_11], %11 {strides = array<i32>} : memref<1x2x128xf32, #tpu.memory_space<vmem>>, vector<1x2x128xf32>,
    %c0_12 = arith.constant 0 : index
    %c0_13 = arith.constant 0 : index
    %c0_14 = arith.constant 0 : index
    %12 = vector.load %arg6[%c0_12, %c0_13, %c0_14] : memref<1x2x128xf32, #tpu.memory_space<vmem>>, vector<1x2x128xf32>
    %13 = vector.shape_cast %12 : vector<1x2x128xf32> to vector<2x128xf32>
    %cst_15 = arith.constant dense<0.000000e+00> : vector<2x128xf32>
    %14 = vector.multi_reduction <add>, %4, %cst_15 [1] : vector<2x2x128xf32> to vector<2x128xf32>
    %15 = arith.addf %13, %14 : vector<2x128xf32>
    %c0_16 = arith.constant 0 : index
    %c0_17 = arith.constant 0 : index
    %c0_18 = arith.constant 0 : index
    %16 = vector.load %arg6[%c0_16, %c0_17, %c0_18] : memref<1x2x128xf32, #tpu.memory_space<vmem>>, vector<1x2x128xf32>
    %17 = vector.shape_cast %16 : vector<1x2x128xf32> to vector<2x128xf32>
    %18 = vector.shape_cast %15 : vector<2x128xf32> to vector<1x2x128xf32>
    tpu.vector_store %arg6[%c0_16, %c0_17, %c0_18], %18 {strides = array<i32>} : memref<1x2x128xf32, #tpu.memory_space<vmem>>, vector<1x2x128xf32>,
    %c0_19 = arith.constant 0 : index
    %c0_20 = arith.constant 0 : index
    %c0_21 = arith.constant 0 : index
    %19 = vector.load %arg7[%c0_19, %c0_20, %c0_21] : memref<1x2x128xf32, #tpu.memory_space<vmem>>, vector<1x2x128xf32>
    %20 = vector.shape_cast %19 : vector<1x2x128xf32> to vector<2x128xf32>
    %21 = arith.mulf %3, %3 : vector<2x2x128xf32>
    %cst_22 = arith.constant dense<0.000000e+00> : vector<2x128xf32>
    %22 = vector.multi_reduction <add>, %21, %cst_22 [1] : vector<2x2x128xf32> to vector<2x128xf32>
    %23 = arith.addf %20, %22 : vector<2x128xf32>
    %c0_23 = arith.constant 0 : index
    %c0_24 = arith.constant 0 : index
    %c0_25 = arith.constant 0 : index
    %24 = vector.load %arg7[%c0_23, %c0_24, %c0_25] : memref<1x2x128xf32, #tpu.memory_space<vmem>>, vector<1x2x128xf32>
    %25 = vector.shape_cast %24 : vector<1x2x128xf32> to vector<2x128xf32>
    %26 = vector.shape_cast %23 : vector<2x128xf32> to vector<1x2x128xf32>
    tpu.vector_store %arg7[%c0_23, %c0_24, %c0_25], %26 {strides = array<i32>} : memref<1x2x128xf32, #tpu.memory_space<vmem>>, vector<1x2x128xf32>,
    %c0_26 = arith.constant 0 : index
    %c0_27 = arith.constant 0 : index
    %c0_28 = arith.constant 0 : index
    %27 = vector.load %arg8[%c0_26, %c0_27, %c0_28] : memref<1x2x128xf32, #tpu.memory_space<vmem>>, vector<1x2x128xf32>
    %28 = vector.shape_cast %27 : vector<1x2x128xf32> to vector<2x128xf32>
    %29 = arith.mulf %4, %4 : vector<2x2x128xf32>
    %cst_29 = arith.constant dense<0.000000e+00> : vector<2x128xf32>
    %30 = vector.multi_reduction <add>, %29, %cst_29 [1] : vector<2x2x128xf32> to vector<2x128xf32>
    %31 = arith.addf %28, %30 : vector<2x128xf32>
    %c0_30 = arith.constant 0 : index
    %c0_31 = arith.constant 0 : index
    %c0_32 = arith.constant 0 : index
    %32 = vector.load %arg8[%c0_30, %c0_31, %c0_32] : memref<1x2x128xf32, #tpu.memory_space<vmem>>, vector<1x2x128xf32>
    %33 = vector.shape_cast %32 : vector<1x2x128xf32> to vector<2x128xf32>
    %34 = vector.shape_cast %31 : vector<2x128xf32> to vector<1x2x128xf32>
    tpu.vector_store %arg8[%c0_30, %c0_31, %c0_32], %34 {strides = array<i32>} : memref<1x2x128xf32, #tpu.memory_space<vmem>>, vector<1x2x128xf32>,
    %c0_33 = arith.constant 0 : index
    %c0_34 = arith.constant 0 : index
    %c0_35 = arith.constant 0 : index
    %35 = vector.load %arg9[%c0_33, %c0_34, %c0_35] : memref<1x2x128xf32, #tpu.memory_space<vmem>>, vector<1x2x128xf32>
    %36 = vector.shape_cast %35 : vector<1x2x128xf32> to vector<2x128xf32>
    %37 = arith.mulf %3, %4 : vector<2x2x128xf32>
    %cst_36 = arith.constant dense<0.000000e+00> : vector<2x128xf32>
    %38 = vector.multi_reduction <add>, %37, %cst_36 [1] : vector<2x2x128xf32> to vector<2x128xf32>
    %39 = arith.addf %36, %38 : vector<2x128xf32>
    %c0_37 = arith.constant 0 : index
    %c0_38 = arith.constant 0 : index
    %c0_39 = arith.constant 0 : index
    %40 = vector.load %arg9[%c0_37, %c0_38, %c0_39] : memref<1x2x128xf32, #tpu.memory_space<vmem>>, vector<1x2x128xf32>
    %41 = vector.shape_cast %40 : vector<1x2x128xf32> to vector<2x128xf32>
    %42 = vector.shape_cast %39 : vector<2x128xf32> to vector<1x2x128xf32>
    tpu.vector_store %arg9[%c0_37, %c0_38, %c0_39], %42 {strides = array<i32>} : memref<1x2x128xf32, #tpu.memory_space<vmem>>, vector<1x2x128xf32>,
    return
  }
  func.func @transform_0(%arg0: i32, %arg1: i32, %arg2: i32) -> (i32, i32, i32) {
    %c1_i32 = arith.constant 1 : i32
    %0 = arith.muli %arg2, %c1_i32 : i32
    %1 = arith.addi %0, %arg0 : i32
    %c0_i32 = arith.constant 0 : i32
    %c0_i32_0 = arith.constant 0 : i32
    return %arg1, %1, %c0_i32 : i32, i32, i32
  }
  func.func @transform_1(%arg0: i32, %arg1: i32, %arg2: i32) -> (i32, i32, i32) {
    %c1_i32 = arith.constant 1 : i32
    %0 = arith.muli %arg2, %c1_i32 : i32
    %1 = arith.addi %0, %arg0 : i32
    %c0_i32 = arith.constant 0 : i32
    %c0_i32_0 = arith.constant 0 : i32
    return %arg1, %1, %c0_i32 : i32, i32, i32
  }
  func.func @transform_2(%arg0: i32, %arg1: i32, %arg2: i32) -> (i32, i32, i32) {
    %c0_i32 = arith.constant 0 : i32
    %c0_i32_0 = arith.constant 0 : i32
    return %arg0, %arg1, %c0_i32 : i32, i32, i32
  }
  func.func @transform_3(%arg0: i32, %arg1: i32, %arg2: i32) -> (i32, i32, i32) {
    %c0_i32 = arith.constant 0 : i32
    %c0_i32_0 = arith.constant 0 : i32
    return %arg0, %arg1, %c0_i32 : i32, i32, i32
  }
  func.func @transform_4(%arg0: i32, %arg1: i32, %arg2: i32) -> (i32, i32, i32) {
    %c0_i32 = arith.constant 0 : i32
    %c0_i32_0 = arith.constant 0 : i32
    return %arg0, %arg1, %c0_i32 : i32, i32, i32
  }
  func.func @transform_5(%arg0: i32, %arg1: i32, %arg2: i32) -> (i32, i32, i32) {
    %c0_i32 = arith.constant 0 : i32
    %c0_i32_0 = arith.constant 0 : i32
    return %arg0, %arg1, %c0_i32 : i32, i32, i32
  }
  func.func @transform_6(%arg0: i32, %arg1: i32, %arg2: i32) -> (i32, i32, i32) {
    %c0_i32 = arith.constant 0 : i32
    %c0_i32_0 = arith.constant 0 : i32
    return %arg0, %arg1, %c0_i32 : i32, i32, i32
  }
}

</mosaic_0001>

<bundles_post_ra>
// kernel: tpu_custom_call.1
= control target key start
LH: loop header
LB: loop body
LE: loop exit
PB: predicated region body
PF: predicated region fallthrough
CT: control target
= control target key end

     0   :  { %12 = vsyncpa [#allocation3], 0  ;;  %s515_s0 = inlined_call_operand.hbm [shape: f32[2,2,128], index: 0, kind: input, shape index: {}]   ;;  %s516_s1 = inlined_call_operand.hbm [shape: f32[2,2,128], index: 1, kind: input, shape index: {}]   ;;  %s517_s2 = inlined_call_operand.hbm [shape: f32[1,2,128], index: 2, kind: output, shape index: {0}]   ;;  %s518_s3 = inlined_call_operand.hbm [shape: f32[1,2,128], index: 3, kind: output, shape index: {1}]   ;;  %s519_s4 = inlined_call_operand.hbm [shape: f32[1,2,128], index: 4, kind: output, shape index: {2}]   ;;  %s520_s5 = inlined_call_operand.hbm [shape: f32[1,2,128], index: 5, kind: output, shape index: {3}]   ;;  %s521_s6 = inlined_call_operand.hbm [shape: f32[1,2,128], index: 6, kind: output, shape index: {4}]  }
   0x1   :  { %13 = vsyncpa [#allocation6], 0 }
   0x2   :  { %14 = vsyncpa [#allocation4], 0 }
   0x3   :  { %15 = vsyncpa [#allocation9], 0 }
   0x4   :  { %16 = vsyncpa [#allocation12], 0  ;;  %s411_s21 = smov [#allocation2]  }
   0x5   :  { %s25_s22 = sshll.u32 %s411_s21, 4  ;;  %s26_s22 = int_to_ptr.vmem [resolvable:$true] %s25_s22 }
   0x6   :  { %s269_s23 = scalar_lea.vmem %s26_s22, 64  ;;  %p274_p1 = scmp.lt.s32.totalorder %s26_s22, %s26_s22 }
   0x7   :  { %p270_p0 = scmp.ne.s32.totalorder %s26_s22, %s269_s23  ;;  %p275_p2 = scmp.lt.s32.totalorder %s269_s23, %s269_s23 }
   0x9   :  { %p276_p3 = por %p275_p2, %p274_p1 }
   0xb   :  { %p277_p4 = pnand %p276_p3, %p270_p0 }
   0xd   :  { %280 = shalt.err (!%p277_p4)
}
   0xe   :  { %s412_s24 = smov 32   ;;  %s413_s25 = smov 2  }
   0xf   :  { %31 = dma.hbm_to_vmem [thread:$0]  %s515_s0, 64, %s26_s22, [#allocation3], %s412_s24, %s412_s24, %s413_s25  }
  0x10   :  { %s414_s28 = smov [#allocation5]  }
  0x11   :  { %s40_s29 = sshll.u32 %s414_s28, 4  ;;  %s41_s29 = int_to_ptr.vmem [resolvable:$true] %s40_s29 }
  0x12   :  { %s289_s30 = scalar_lea.vmem %s41_s29, 64  ;;  %p294_p6 = scmp.lt.s32.totalorder %s41_s29, %s41_s29 }
  0x13   :  { %p290_p5 = scmp.ne.s32.totalorder %s41_s29, %s289_s30  ;;  %p295_p7 = scmp.lt.s32.totalorder %s289_s30, %s289_s30 }
  0x15   :  { %p296_p8 = por %p295_p7, %p294_p6 }
  0x17   :  { %p297_p9 = pnand %p296_p8, %p290_p5 }
  0x19   :  { %300 = shalt.err (!%p297_p9)
}
  0x1a   :  { %46 = dma.hbm_to_vmem [thread:$0]  %s516_s1, 64, %s41_s29, [#allocation6], %s412_s24, %s412_s24, %s413_s25  }
  0x1b   :  { %401 = dma.done.wait [#allocation3], 64  }
  0x1c   :  { %402 = vsyncadd [#allocation3], 4294967232 }
  0x1d   :  { %403 = dma.done.wait [#allocation6], 64  }
  0x1e   :  { %404 = vsyncadd [#allocation6], 4294967232  ;;  %v415_v0 = vmov 0.0   ;;  %vm69_vm0 = vcmask 1041408   ;;  %v66_v1 = vld [vmem:[#allocation5] sm:$0x3] }
  0x1f   :  { %60 = vst [vmem:[#allocation8] sm:$0x3] %v415_v0  ;;  %59 = vst [vmem:[#allocation7] sm:$0x3] %v415_v0  ;;  %v462_v2 = vld [vmem:[#allocation5 + $0x2] sm:$0x3]  ;;  %v136_v6 = vmul.f32 %v66_v1, %v66_v1 }
  0x20   :  { %61 = vst [vmem:[#allocation10] sm:$0x3] %v415_v0  ;;  %62 = vst [vmem:[#allocation11] sm:$0x3] %v415_v0  ;;  %v64_v3 = vld [vmem:[#allocation2] sm:$0x3]  ;;  %v137_v7 = vmul.f32 %v462_v2, %v462_v2 }
  0x21   :  { %63 = vst [vmem:[#allocation13] sm:$0x3] %v415_v0  ;;  %v92_v4 = vsel %vm69_vm0, %v66_v1, 0.0  ;;  %v99_v5 = vsel %vm69_vm0, %v462_v2, 0.0  ;;  %v65_v10 = vld [vmem:[#allocation2 + $0x2] sm:$0x3]  ;;  %v113_v11 = vmul.f32 %v64_v3, %v64_v3  ;;  %v469_v12 = vmul.f32 %v66_v1, %v64_v3 }
  0x22   :  { %v93_v8 = vrot.slane %v92_v4, 4  ;;  %v100_v9 = vrot.slane %v99_v5, 4  ;;  %vm86_vm1 = vcmask 1041409   ;;  %v138_v13 = vsel %vm69_vm0, %v136_v6, 0.0  ;;  %s416_s0 = smov [#allocation8]   ;;  %s417_s9 = smov [#allocation11]  }
  0x23   :  { %v145_v14 = vsel %vm69_vm0, %v137_v7, 0.0  ;;  %v70_v15 = vsel %vm69_vm0, %v64_v3, 0.0  ;;  %v77_v16 = vsel %vm69_vm0, %v65_v10, 0.0  ;;  %v139_v19 = vrot.slane %v138_v13, 4  ;;  %s197_s1 = sshll.u32 %s416_s0, 4  ;;  %s217_s10 = sshll.u32 %s417_s9, 4  ;;  %s198_s1 = int_to_ptr.vmem [resolvable:$true] %s197_s1  ;;  %s484_s10 = int_to_ptr.vmem [resolvable:$true] %s217_s10 }
  0x24   :  { %v94_v17 = vadd.f32 %v93_v8, %v92_v4  ;;  %v101_v18 = vadd.f32 %v100_v9, %v99_v5  ;;  %v146_v20 = vrot.slane %v145_v14, 4  ;;  %v71_v21 = vrot.slane %v70_v15, 4  ;;  %s418_s11 = smov [#allocation7]   ;;  %s301_s13 = scalar_lea.vmem %s198_s1, 32 }
  0x25   :  { %v78_v22 = vrot.slane %v77_v16, 4  ;;  %v114_v23 = vmul.f32 %v65_v10, %v65_v10  ;;  %v115_v24 = vsel %vm69_vm0, %v113_v11, 0.0  ;;  %v140_v27 = vadd.f32 %v139_v19, %v138_v13  ;;  %s187_s12 = sshll.u32 %s418_s11, 4  ;;  %p302_p10 = scmp.ne.s32.totalorder %s198_s1, %s301_s13  ;;  %s486_s12 = int_to_ptr.vmem [resolvable:$true] %s187_s12 }
  0x26   :  { %v95_v25 = vrot.slane %v94_v17, 2  ;;  %v102_v26 = vrot.slane %v101_v18, 2  ;;  %v147_v28 = vadd.f32 %v146_v20, %v145_v14  ;;  %v72_v29 = vadd.f32 %v71_v21, %v70_v15  ;;  %v91_v49 = vld [vmem:[#allocation8] sm:$0x3]  ;;  %v68_v0 = vld [vmem:[#allocation7] sm:$0x3]  ;;  %p306_p11 = scmp.lt.s32.totalorder %s198_s1, %s198_s1  ;;  %p307_p12 = scmp.lt.s32.totalorder %s301_s13, %s301_s13 }
  0x27   :  { %v79_v30 = vadd.f32 %v78_v22, %v77_v16  ;;  %v116_v31 = vrot.slane %v115_v24, 4  ;;  %v122_v32 = vsel %vm69_vm0, %v114_v23, 0.0  ;;  %v141_v35 = vrot.slane %v140_v27, 2  ;;  %v135_v59 = vld [vmem:[#allocation11] sm:$0x3] }
  0x28   :  { %v96_v33 = vadd.f32 %v95_v25, %v94_v17  ;;  %v103_v34 = vadd.f32 %v102_v26, %v101_v18  ;;  %v148_v36 = vrot.slane %v147_v28, 2  ;;  %v73_v37 = vrot.slane %v72_v29, 2  ;;  %p308_p13 = por %p307_p12, %p306_p11 }
  0x29   :  { %v80_v38 = vrot.slane %v79_v30, 2  ;;  %v117_v39 = vadd.f32 %v116_v31, %v115_v24  ;;  %v123_v40 = vrot.slane %v122_v32, 4  ;;  %v142_v43 = vadd.f32 %v141_v35, %v140_v27 }
  0x2a   :  { %v97_v41 = vrot.slane %v96_v33, 1  ;;  %v104_v42 = vrot.slane %v103_v34, 1  ;;  %v149_v44 = vadd.f32 %v148_v36, %v147_v28  ;;  %v74_v45 = vadd.f32 %v73_v37, %v72_v29  ;;  %p309_p0 = pnand %p308_p13, %p302_p10 }
  0x2b   :  { %v81_v46 = vadd.f32 %v80_v38, %v79_v30  ;;  %v118_v47 = vrot.slane %v117_v39, 2  ;;  %v124_v48 = vadd.f32 %v123_v40, %v122_v32  ;;  %v143_v52 = vrot.slane %v142_v43, 1 }
  0x2c   :  { %v98_v50 = vadd.f32 %v97_v41, %v96_v33  ;;  %v105_v51 = vadd.f32 %v104_v42, %v103_v34  ;;  %v150_v53 = vrot.slane %v149_v44, 1  ;;  %v75_v54 = vrot.slane %v74_v45, 1 }
  0x2d   :  { %v82_v55 = vrot.slane %v81_v46, 1  ;;  %v119_v56 = vadd.f32 %v118_v47, %v117_v39  ;;  %v125_v57 = vrot.slane %v124_v48, 2  ;;  %v144_v60 = vadd.f32 %v143_v52, %v142_v43 }
  0x2e   :  { %v108_v58 = vsel %vm86_vm1, %v105_v51, %v98_v50  ;;  %v151_v61 = vadd.f32 %v150_v53, %v149_v44  ;;  %v160_v62 = vmul.f32 %v462_v2, %v65_v10  ;;  %v76_v1 = vadd.f32 %v75_v54, %v74_v45 }
  0x2f   :  { %v110_v63 = vadd.f32 %v108_v58, %v91_v49  ;;  %v83_v3 = vadd.f32 %v82_v55, %v81_v46  ;;  %v120_v4 = vrot.slane %v119_v56, 1  ;;  %v126_v6 = vadd.f32 %v125_v57, %v124_v48 }
  0x30   :  { %v154_v5 = vsel %vm86_vm1, %v151_v61, %v144_v60  ;;  %v161_v7 = vsel %vm69_vm0, %v469_v12, 0.0  ;;  %v168_v8 = vsel %vm69_vm0, %v160_v62, 0.0 }
  0x31   :  { %111 = vst [vmem:[#allocation8] sm:$0x3] %v110_v63  ;;  %v156_v2 = vadd.f32 %v154_v5, %v135_v59  ;;  %v87_v9 = vsel %vm86_vm1, %v83_v3, %v76_v1  ;;  %v162_v10 = vrot.slane %v161_v7, 4  ;;  %v121_v13 = vadd.f32 %v120_v4, %v119_v56 }
  0x32   :  { %v89_v11 = vadd.f32 %v87_v9, %v68_v0  ;;  %v127_v14 = vrot.slane %v126_v6, 1  ;;  %v169_v15 = vrot.slane %v168_v8, 4 }
  0x33   :  { %312 = shalt.err (!%p309_p0)
}
  0x34   :  { %200 = dma.vmem_to_hbm [thread:$0]  %s198_s1, 32, %s518_s3, [#allocation9]   ;;  %157 = vst [vmem:[#allocation11] sm:$0x3] %v156_v2  ;;  %v163_v12 = vadd.f32 %v162_v10, %v161_v7  ;;  %90 = vst [vmem:[#allocation7] sm:$0x3] %v89_v11  ;;  %v128_v17 = vadd.f32 %v127_v14, %v126_v6  ;;  %v170_v18 = vadd.f32 %v169_v15, %v168_v8 }
  0x35   :  { %s419_s16 = smov [#allocation10]   ;;  %v112_v16 = vld [vmem:[#allocation10] sm:$0x3]  ;;  %s321_s18 = scalar_lea.vmem %s484_s10, 32 }
  0x36   :  { %s207_s17 = sshll.u32 %s419_s16, 4  ;;  %p322_p1 = scmp.ne.s32.totalorder %s484_s10, %s321_s18  ;;  %s208_s17 = int_to_ptr.vmem [resolvable:$true] %s207_s17 }
  0x37   :  { %p326_p2 = scmp.lt.s32.totalorder %s484_s10, %s484_s10  ;;  %p327_p3 = scmp.lt.s32.totalorder %s321_s18, %s321_s18 }
  0x39   :  { %p328_p4 = por %p327_p3, %p326_p2 }
  0x3b   :  { %p329_p5 = pnand %p328_p4, %p322_p1 }
  0x3d   :  { %332 = shalt.err (!%p329_p5)
}
  0x3e   :  { %220 = dma.vmem_to_hbm [thread:$0]  %s484_s10, 32, %s520_s5, [#allocation12]   ;;  %v164_v19 = vrot.slane %v163_v12, 2 }
  0x3f   :  { %s341_s3 = scalar_lea.vmem %s486_s12, 32  ;;  %p346_p7 = scmp.lt.s32.totalorder %s486_s12, %s486_s12 }
  0x40   :  { %p342_p6 = scmp.ne.s32.totalorder %s486_s12, %s341_s3  ;;  %p347_p8 = scmp.lt.s32.totalorder %s341_s3, %s341_s3 }
  0x42   :  { %p348_p9 = por %p347_p8, %p346_p7 }
  0x44   :  { %p349_p10 = pnand %p348_p9, %p342_p6 }
  0x46   :  { %352 = shalt.err (!%p349_p10)
}
  0x47   :  { %190 = dma.vmem_to_hbm [thread:$0]  %s486_s12, 32, %s517_s2, [#allocation4]   ;;  %v131_v20 = vsel %vm86_vm1, %v128_v17, %v121_v13  ;;  %v171_v21 = vrot.slane %v170_v18, 2  ;;  %v165_v23 = vadd.f32 %v164_v19, %v163_v12 }
  0x48   :  { %v133_v22 = vadd.f32 %v131_v20, %v112_v16  ;;  %s361_s5 = scalar_lea.vmem %s208_s17, 32  ;;  %p366_p12 = scmp.lt.s32.totalorder %s208_s17, %s208_s17 }
  0x49   :  { %v172_v24 = vadd.f32 %v171_v21, %v170_v18  ;;  %v166_v25 = vrot.slane %v165_v23, 1  ;;  %p362_p11 = scmp.ne.s32.totalorder %s208_s17, %s361_s5  ;;  %p367_p13 = scmp.lt.s32.totalorder %s361_s5, %s361_s5 }
  0x4a   :  { %134 = vst [vmem:[#allocation10] sm:$0x3] %v133_v22 }
  0x4b   :  { %v173_v26 = vrot.slane %v172_v24, 1  ;;  %p368_p0 = por %p367_p13, %p366_p12 }
  0x4d   :  { %p369_p1 = pnand %p368_p0, %p362_p11 }
  0x4f   :  { %372 = shalt.err (!%p369_p1)
}
  0x50   :  { %210 = dma.vmem_to_hbm [thread:$0]  %s208_s17, 32, %s519_s4, [#allocation9]   ;;  %v167_v27 = vadd.f32 %v166_v25, %v165_v23  ;;  %v158_v28 = vld [vmem:[#allocation13] sm:$0x3]  ;;  %v174_v29 = vadd.f32 %v173_v26, %v172_v24 }
  0x51   :  { %s420_s2 = smov [#allocation13]  }
  0x52   :  { %s227_s25 = sshll.u32 %s420_s2, 4  ;;  %v177_v30 = vsel %vm86_vm1, %v174_v29, %v167_v27  ;;  %s228_s25 = int_to_ptr.vmem [resolvable:$true] %s227_s25 }
  0x53   :  { %v179_v31 = vadd.f32 %v177_v30, %v158_v28  ;;  %s381_s26 = scalar_lea.vmem %s228_s25, 32  ;;  %p386_p3 = scmp.lt.s32.totalorder %s228_s25, %s228_s25 }
  0x54   :  { %p382_p2 = scmp.ne.s32.totalorder %s228_s25, %s381_s26  ;;  %p387_p4 = scmp.lt.s32.totalorder %s381_s26, %s381_s26 }
  0x55   :  { %180 = vst [vmem:[#allocation13] sm:$0x3] %v179_v31 }
  0x56   :  { %p388_p5 = por %p387_p4, %p386_p3 }
  0x58   :  { %p389_p6 = pnand %p388_p5, %p382_p2 }
  0x5a   :  { %392 = shalt.err (!%p389_p6)
}
  0x5b   :  { %230 = dma.vmem_to_hbm [thread:$0]  %s228_s25, 32, %s521_s6, [#allocation12]  }
  0x5c   :  { %405 = dma.done.wait [#allocation4], 32  }
  0x5d   :  { %406 = vsyncadd [#allocation4], 4294967264 }
  0x5e   :  { %407 = dma.done.wait [#allocation9], 64  }
  0x5f   :  { %408 = vsyncadd [#allocation9], 4294967232 }
  0x60   :  { %409 = dma.done.wait [#allocation12], 64  }
  0x61   :  { %410 = vsyncadd [#allocation12], 4294967232 }
  0x62   :  { %246 = vsyncpa [#allocation3], 1 }
  0x63   :  { %247 = vsyncpa [#allocation6], 1 }
  0x64   :  { %248 = vsyncpa [#allocation4], 1 }
  0x65   :  { %249 = vsyncpa [#allocation9], 1 }
  0x66   :  { %250 = vsyncpa [#allocation12], 1 }

</bundles_post_ra>
